<compile_context>
chip_gen: v6e
topology: v6e:2x2x1
jax: 0.10.0
libtpu: 0.0.40
codegen_flags: <defaults>
</compile_context>

<pallas_src>
import functools

import jax
import jax.numpy as jnp
from jax.experimental import pallas as pl
from jax.experimental.pallas import tpu as pltpu


def _round_up(x, m):
    return (x + m - 1) // m * m


def _pick_h_chunk(H, requested):
    c = max(128, (min(requested, H) // 128) * 128)
    while H % c:
        c -= 128
    return c


# ----------------------------- Pallas kernel --------------------------------
def _expert_mlp_kernel(xg_ref, w1_ref, b1_ref, w2_ref, b2_ref, o_ref, *, h_chunk):
    """One (tm, C) tile of one expert's dispatched tokens -> ReLU MLP.

    All refs are already this expert's slabs (the BlockSpec squeezes the expert
    axis).  The accumulator is a local f32 value (vregs); o_ref is written once.
    """
    x = xg_ref[...]                                         # (tm, C) bf16
    H = w1_ref.shape[1]
    acc = jnp.zeros(o_ref.shape, jnp.float32)
    for c0 in range(0, H, h_chunk):                         # static, short loop
        c1 = c0 + h_chunk
        h = jnp.dot(x, w1_ref[:, c0:c1],
                    preferred_element_type=jnp.float32)     # (tm, hc) f32
        h = jnp.maximum(h + b1_ref[:, c0:c1], 0.0).astype(w2_ref.dtype)
        acc = acc + jnp.dot(h, w2_ref[c0:c1, :],
                            preferred_element_type=jnp.float32)
    o_ref[...] = (acc + b2_ref[...]).astype(o_ref.dtype)


def moe_expert_pallas(xg, w1, b1, w2, b2, *, tm, h_chunk=256):
    """xg: (E, cap_pad, C) bf16 dispatched tokens; w1: (E, C, H) bf16;
    b1: (E, 1, H) f32; w2: (E, H, C) bf16; b2: (E, 1, C) f32.
    Returns (E, cap_pad, C) f32 un-gated expert outputs."""
    E, cap_pad, C = xg.shape
    _, _, H = w1.shape
    assert cap_pad % tm == 0 and tm % 8 == 0
    assert C % 128 == 0 and H % 128 == 0, "pad C/H to multiples of 128"
    h_chunk = _pick_h_chunk(H, h_chunk)
    n_row_tiles = cap_pad // tm

    # VMEM budget: one expert's weight slabs + one x/out tile, double-buffered.
    per_step = (tm * C * xg.dtype.itemsize
                + C * H * w1.dtype.itemsize + H * b1.dtype.itemsize
                + H * C * w2.dtype.itemsize + C * b2.dtype.itemsize
                + tm * C * 4)
    est = 2 * per_step
    # Cap at 48 MiB -> headroom even on v7x's 64 MiB VMEM per TensorCore.
    vmem_limit = int(min(max(2 * est, 16 << 20), 48 << 20))

    kernel = functools.partial(_expert_mlp_kernel, h_chunk=h_chunk)
    return pl.pallas_call(
        kernel,
        out_shape=jax.ShapeDtypeStruct((E, cap_pad, C), jnp.float32),
        grid_spec=pltpu.PrefetchScalarGridSpec(
            num_scalar_prefetch=0,
            grid=(E, n_row_tiles),
            in_specs=[
                pl.BlockSpec((None, tm, C), lambda e, i: (e, i, 0)),   # x tile
                pl.BlockSpec((None, C, H), lambda e, i: (e, 0, 0)),    # W1[e]
                pl.BlockSpec((None, 1, H), lambda e, i: (e, 0, 0)),    # b1[e]
                pl.BlockSpec((None, H, C), lambda e, i: (e, 0, 0)),    # W2[e]
                pl.BlockSpec((None, 1, C), lambda e, i: (e, 0, 0)),    # b2[e]
            ],
            out_specs=pl.BlockSpec((None, tm, C), lambda e, i: (e, i, 0)),
        ),
        compiler_params=pltpu.CompilerParams(
            dimension_semantics=("parallel", "parallel"),
            vmem_limit_bytes=vmem_limit),
    )(xg, w1, b1, w2, b2)


# ------------------------------ JAX glue -------------------------------------
def _route(flat_x, params, noise_flat, *, top_k, capacity_factor):
    """NoisyTopkRouter + capacity limit -> per-token gates, keep mask, indices."""
    N, _ = flat_x.shape
    E = params["w_route"].shape[1]
    logits = flat_x @ params["w_route"] + params["b_route"]            # (N, E)
    noise_logits = flat_x @ params["w_noise"] + params["b_noise"]      # (N, E)
    noisy = logits + noise_flat * jax.nn.softplus(noise_logits)
    _, top_idx = jax.lax.top_k(noisy, top_k)                           # (N, k)
    topk_mask = jnp.any(
        top_idx[:, :, None] == jnp.arange(E)[None, None, :], axis=1)   # (N, E)
    gating = jax.nn.softmax(jnp.where(topk_mask, noisy, -jnp.inf), axis=-1)

    capacity = int(N * top_k / E * capacity_factor)
    ranks = jnp.cumsum(topk_mask.astype(jnp.int32), axis=0) - 1        # flat order
    keep = topk_mask & (ranks < capacity)                              # (N, E)
    gates = jnp.where(keep, gating, 0.0).astype(jnp.float32)           # no renorm (matches torch ref)
    return gates, keep, top_idx, capacity


def sparse_moe_forward(x, params, noise, *, top_k, capacity_factor,
                       tm=128, h_chunk=256):
    """Reproduces SparseMoE.forward: returns (final_output, indices)."""
    B, T, C = x.shape
    E = params["w_route"].shape[1]
    N = B * T
    flat_x = x.reshape(N, C)
    gates, keep, top_idx, capacity = _route(
        flat_x, params, noise.reshape(N, E),
        top_k=top_k, capacity_factor=capacity_factor)

    # ---- capacity-dispatch (token grouping): build (E, cap_pad) slot tables ----
    tm_eff = max(8, min(tm, _round_up(max(capacity, 1), 8)) // 8 * 8)
    cap_pad = _round_up(max(capacity, 1), tm_eff)

    rank = jnp.cumsum(keep.astype(jnp.int32), axis=0) - 1              # slot within expert
    rows = jnp.where(keep, jnp.arange(E)[None, :], E).astype(jnp.int32).reshape(-1)
    cols = jnp.where(keep, rank, 0).astype(jnp.int32).reshape(-1)
    tok = jnp.broadcast_to(jnp.arange(N, dtype=jnp.int32)[:, None], (N, E)).reshape(-1)
    disp_idx = jnp.zeros((E, cap_pad), jnp.int32).at[rows, cols].set(tok, mode="drop")
    disp_gate = jnp.zeros((E, cap_pad), jnp.float32).at[rows, cols].set(
        gates.reshape(-1), mode="drop")

    # gather tokens (bf16 once, in the wrapper) into the dense dispatch slab
    flat_x_bf = flat_x.astype(params["w1"].dtype)
    xg = jnp.take(flat_x_bf, disp_idx.reshape(-1), axis=0).reshape(E, cap_pad, C)

    out_g = moe_expert_pallas(xg, params["w1"], params["b1"],
                              params["w2"], params["b2"],
                              tm=tm_eff, h_chunk=h_chunk)              # (E, cap_pad, C) f32

    # combine: gate-weight and scatter-add back to token order (index_add_)
    weighted = out_g.reshape(E * cap_pad, C) * disp_gate.reshape(E * cap_pad, 1)
    out_flat = jnp.zeros((N, C), jnp.float32).at[disp_idx.reshape(-1)].add(weighted)
    return out_flat.reshape(B, T, C).astype(x.dtype), top_idx.reshape(B, T, top_k)


def _reference_dense(flat_x, params, gates):
    """Plain-JAX reference (same bf16 operand / f32 accumulation precision)."""
    E = params["w1"].shape[0]
    out = jnp.zeros(flat_x.shape, jnp.float32)
    x_bf = flat_x.astype(params["w1"].dtype)
    for e in range(E):
        h = jnp.dot(x_bf, params["w1"][e],
                    preferred_element_type=jnp.float32) + params["b1"][e]
        h = jnp.maximum(h, 0.0).astype(params["w2"].dtype)
        y = jnp.dot(h, params["w2"][e],
                    preferred_element_type=jnp.float32) + params["b2"][e]
        out = out + y * gates[:, e:e + 1]
    return out.astype(flat_x.dtype)


# ------------------------------ main -----------------------------------------
if __name__ == "__main__":
    # Small but lane-dense shapes consistent with the module (H = 4*C).
    B, T, C = 4, 64, 128
    E, TOP_K, CAP = 8, 2, 1.0
    H = 4 * C

    key = jax.random.PRNGKey(0)
    ks = jax.random.split(key, 10)
    params = {
        "w_route": 0.05 * jax.random.normal(ks[0], (C, E), jnp.float32),
        "b_route": jnp.zeros((E,), jnp.float32),
        "w_noise": 0.05 * jax.random.normal(ks[1], (C, E), jnp.float32),
        "b_noise": jnp.zeros((E,), jnp.float32),
        # MXU operands in bf16, biases / accumulation in f32.
        "w1": (0.05 * jax.random.normal(ks[2], (E, C, H), jnp.float32)
               ).astype(jnp.bfloat16),
        "b1": 0.01 * jax.random.normal(ks[3], (E, 1, H), jnp.float32),
        "w2": (0.05 * jax.random.normal(ks[4], (E, H, C), jnp.float32)
               ).astype(jnp.bfloat16),
        "b2": 0.01 * jax.random.normal(ks[5], (E, 1, C), jnp.float32),
    }
    x = jax.random.normal(ks[6], (B, T, C), jnp.float32)
    noise = jax.random.normal(ks[7], (B, T, E), jnp.float32)

    out, indices = sparse_moe_forward(x, params, noise,
                                      top_k=TOP_K, capacity_factor=CAP,
                                      tm=128, h_chunk=256)
    out = jax.block_until_ready(out)
    indices = jax.block_until_ready(indices)

    # correctness check against plain-JAX dense reference (same gates)
    flat_x = x.reshape(-1, C)
    gates_ref, _, top_idx_ref, _ = _route(flat_x, params, noise.reshape(-1, E),
                                          top_k=TOP_K, capacity_factor=CAP)
    ref = _reference_dense(flat_x, params, gates_ref).reshape(B, T, C)

    assert out.shape == (B, T, C) and indices.shape == (B, T, TOP_K)
    assert jnp.array_equal(indices, top_idx_ref.reshape(B, T, TOP_K))
    assert jnp.allclose(out, ref, atol=2e-3, rtol=2e-3)
    print("KERNEL_OK")
</pallas_src>

<mosaic_0001>
module attributes {stable_mosaic.version = 11 : i64} {
  func.func @_expert_mlp_kernel(%arg0: i32, %arg1: i32, %arg2: memref<1x64x128xbf16, #tpu.memory_space<vmem>>, %arg3: memref<1x128x512xbf16, #tpu.memory_space<vmem>>, %arg4: memref<1x1x512xf32, #tpu.memory_space<vmem>>, %arg5: memref<1x512x128xbf16, #tpu.memory_space<vmem>>, %arg6: memref<1x1x128xf32, #tpu.memory_space<vmem>>, %arg7: memref<1x64x128xf32, #tpu.memory_space<vmem>>) attributes {dimension_semantics = [#tpu.dimension_semantics<parallel>, #tpu.dimension_semantics<parallel>], iteration_bounds = array<i64: 8, 1>, scalar_prefetch = 0 : i64, scratch_operands = 0 : i64, tpu.core_type = #tpu.core_type<tc>, window_params = [{transform_indices = @transform_0, window_bounds = array<i64: 1, 64, 128>}, {transform_indices = @transform_1, window_bounds = array<i64: 1, 128, 512>}, {transform_indices = @transform_2, window_bounds = array<i64: 1, 1, 512>}, {transform_indices = @transform_3, window_bounds = array<i64: 1, 512, 128>}, {transform_indices = @transform_4, window_bounds = array<i64: 1, 1, 128>}, {transform_indices = @transform_5, window_bounds = array<i64: 1, 64, 128>}]} {
    %c0 = arith.constant 0 : index
    %c0_0 = arith.constant 0 : index
    %c0_1 = arith.constant 0 : index
    %0 = vector.load %arg2[%c0, %c0_0, %c0_1] : memref<1x64x128xbf16, #tpu.memory_space<vmem>>, vector<1x64x128xbf16>
    %1 = vector.shape_cast %0 : vector<1x64x128xbf16> to vector<64x128xbf16>
    %cst = arith.constant 0.000000e+00 : f32
    %2 = vector.broadcast %cst : f32 to vector<64x128xf32>
    %c0_2 = arith.constant 0 : index
    %c0_3 = arith.constant 0 : index
    %c0_4 = arith.constant 0 : index
    %3 = vector.load %arg3[%c0_2, %c0_3, %c0_4] : memref<1x128x512xbf16, #tpu.memory_space<vmem>>, vector<1x128x256xbf16>
    %4 = vector.shape_cast %3 : vector<1x128x256xbf16> to vector<128x256xbf16>
    %cst_5 = arith.constant dense<0.000000e+00> : vector<64x256xf32>
    %5 = tpu.matmul %1, %4, %cst_5 {dimension_numbers = #tpu.dot_dimension_numbers<[1], [0], [0], [1], [0, 0, 1, 1], [], []>} : vector<64x128xbf16>, vector<128x256xbf16>, vector<64x256xf32> -> vector<64x256xf32>
    %c0_6 = arith.constant 0 : index
    %c0_7 = arith.constant 0 : index
    %c0_8 = arith.constant 0 : index
    %6 = vector.load %arg4[%c0_6, %c0_7, %c0_8] : memref<1x1x512xf32, #tpu.memory_space<vmem>>, vector<1x1x256xf32>
    %7 = vector.shape_cast %6 : vector<1x1x256xf32> to vector<1x256xf32>
    %8 = vector.broadcast %7 : vector<1x256xf32> to vector<64x256xf32>
    %9 = arith.addf %5, %8 : vector<64x256xf32>
    %cst_9 = arith.constant 0.000000e+00 : f32
    %10 = vector.broadcast %cst_9 : f32 to vector<64x256xf32>
    %11 = arith.maximumf %9, %10 : vector<64x256xf32>
    %12 = arith.truncf %11 : vector<64x256xf32> to vector<64x256xbf16>
    %c0_10 = arith.constant 0 : index
    %c0_11 = arith.constant 0 : index
    %c0_12 = arith.constant 0 : index
    %13 = vector.load %arg5[%c0_10, %c0_11, %c0_12] : memref<1x512x128xbf16, #tpu.memory_space<vmem>>, vector<1x256x128xbf16>
    %14 = vector.shape_cast %13 : vector<1x256x128xbf16> to vector<256x128xbf16>
    %cst_13 = arith.constant dense<0.000000e+00> : vector<64x128xf32>
    %15 = tpu.matmul %12, %14, %cst_13 {dimension_numbers = #tpu.dot_dimension_numbers<[1], [0], [0], [1], [0, 0, 1, 1], [], []>} : vector<64x256xbf16>, vector<256x128xbf16>, vector<64x128xf32> -> vector<64x128xf32>
    %16 = arith.addf %2, %15 : vector<64x128xf32>
    %c0_14 = arith.constant 0 : index
    %c0_15 = arith.constant 0 : index
    %c256 = arith.constant 256 : index
    %17 = vector.load %arg3[%c0_14, %c0_15, %c256] : memref<1x128x512xbf16, #tpu.memory_space<vmem>>, vector<1x128x256xbf16>
    %18 = vector.shape_cast %17 : vector<1x128x256xbf16> to vector<128x256xbf16>
    %cst_16 = arith.constant dense<0.000000e+00> : vector<64x256xf32>
    %19 = tpu.matmul %1, %18, %cst_16 {dimension_numbers = #tpu.dot_dimension_numbers<[1], [0], [0], [1], [0, 0, 1, 1], [], []>} : vector<64x128xbf16>, vector<128x256xbf16>, vector<64x256xf32> -> vector<64x256xf32>
    %c0_17 = arith.constant 0 : index
    %c0_18 = arith.constant 0 : index
    %c256_19 = arith.constant 256 : index
    %20 = vector.load %arg4[%c0_17, %c0_18, %c256_19] : memref<1x1x512xf32, #tpu.memory_space<vmem>>, vector<1x1x256xf32>
    %21 = vector.shape_cast %20 : vector<1x1x256xf32> to vector<1x256xf32>
    %22 = vector.broadcast %21 : vector<1x256xf32> to vector<64x256xf32>
    %23 = arith.addf %19, %22 : vector<64x256xf32>
    %cst_20 = arith.constant 0.000000e+00 : f32
    %24 = vector.broadcast %cst_20 : f32 to vector<64x256xf32>
    %25 = arith.maximumf %23, %24 : vector<64x256xf32>
    %26 = arith.truncf %25 : vector<64x256xf32> to vector<64x256xbf16>
    %c0_21 = arith.constant 0 : index
    %c256_22 = arith.constant 256 : index
    %c0_23 = arith.constant 0 : index
    %27 = vector.load %arg5[%c0_21, %c256_22, %c0_23] : memref<1x512x128xbf16, #tpu.memory_space<vmem>>, vector<1x256x128xbf16>
    %28 = vector.shape_cast %27 : vector<1x256x128xbf16> to vector<256x128xbf16>
    %cst_24 = arith.constant dense<0.000000e+00> : vector<64x128xf32>
    %29 = tpu.matmul %26, %28, %cst_24 {dimension_numbers = #tpu.dot_dimension_numbers<[1], [0], [0], [1], [0, 0, 1, 1], [], []>} : vector<64x256xbf16>, vector<256x128xbf16>, vector<64x128xf32> -> vector<64x128xf32>
    %30 = arith.addf %16, %29 : vector<64x128xf32>
    %c0_25 = arith.constant 0 : index
    %c0_26 = arith.constant 0 : index
    %c0_27 = arith.constant 0 : index
    %31 = vector.load %arg6[%c0_25, %c0_26, %c0_27] : memref<1x1x128xf32, #tpu.memory_space<vmem>>, vector<1x1x128xf32>
    %32 = vector.shape_cast %31 : vector<1x1x128xf32> to vector<1x128xf32>
    %33 = vector.broadcast %32 : vector<1x128xf32> to vector<64x128xf32>
    %34 = arith.addf %30, %33 : vector<64x128xf32>
    %c0_28 = arith.constant 0 : index
    %c0_29 = arith.constant 0 : index
    %c0_30 = arith.constant 0 : index
    %35 = vector.load %arg7[%c0_28, %c0_29, %c0_30] : memref<1x64x128xf32, #tpu.memory_space<vmem>>, vector<1x64x128xf32>
    %36 = vector.shape_cast %35 : vector<1x64x128xf32> to vector<64x128xf32>
    %37 = vector.shape_cast %34 : vector<64x128xf32> to vector<1x64x128xf32>
    tpu.vector_store %arg7[%c0_28, %c0_29, %c0_30], %37 {strides = array<i32>} : memref<1x64x128xf32, #tpu.memory_space<vmem>>, vector<1x64x128xf32>,
    return
  }
  func.func @transform_0(%arg0: i32, %arg1: i32) -> (i32, i32, i32) {
    %c0_i32 = arith.constant 0 : i32
    %c0_i32_0 = arith.constant 0 : i32
    return %arg0, %arg1, %c0_i32 : i32, i32, i32
  }
  func.func @transform_1(%arg0: i32, %arg1: i32) -> (i32, i32, i32) {
    %c0_i32 = arith.constant 0 : i32
    %c0_i32_0 = arith.constant 0 : i32
    %c0_i32_1 = arith.constant 0 : i32
    return %arg0, %c0_i32, %c0_i32_0 : i32, i32, i32
  }
  func.func @transform_2(%arg0: i32, %arg1: i32) -> (i32, i32, i32) {
    %c0_i32 = arith.constant 0 : i32
    %c0_i32_0 = arith.constant 0 : i32
    %c0_i32_1 = arith.constant 0 : i32
    return %arg0, %c0_i32, %c0_i32_0 : i32, i32, i32
  }
  func.func @transform_3(%arg0: i32, %arg1: i32) -> (i32, i32, i32) {
    %c0_i32 = arith.constant 0 : i32
    %c0_i32_0 = arith.constant 0 : i32
    %c0_i32_1 = arith.constant 0 : i32
    return %arg0, %c0_i32, %c0_i32_0 : i32, i32, i32
  }
  func.func @transform_4(%arg0: i32, %arg1: i32) -> (i32, i32, i32) {
    %c0_i32 = arith.constant 0 : i32
    %c0_i32_0 = arith.constant 0 : i32
    %c0_i32_1 = arith.constant 0 : i32
    return %arg0, %c0_i32, %c0_i32_0 : i32, i32, i32
  }
  func.func @transform_5(%arg0: i32, %arg1: i32) -> (i32, i32, i32) {
    %c0_i32 = arith.constant 0 : i32
    %c0_i32_0 = arith.constant 0 : i32
    return %arg0, %arg1, %c0_i32 : i32, i32, i32
  }
}

</mosaic_0001>

<bundles_post_ra>
// kernel: tpu_custom_call.1
= control target key start
LH: loop header
LB: loop body
LE: loop exit
PB: predicated region body
PF: predicated region fallthrough
CT: control target
= control target key end

     0   :  { %s2448_s0 = inlined_call_operand.hbm [shape: bf16[8,64,128], index: 0, kind: input, shape index: {}]   ;;  %s2449_s1 = inlined_call_operand.hbm [shape: bf16[8,128,512], index: 1, kind: input, shape index: {}]   ;;  %s2450_s2 = inlined_call_operand.hbm [shape: f32[8,1,512], index: 2, kind: input, shape index: {}]   ;;  %s2451_s3 = inlined_call_operand.hbm [shape: bf16[8,512,128], index: 3, kind: input, shape index: {}]   ;;  %s2452_s4 = inlined_call_operand.hbm [shape: f32[8,1,128], index: 4, kind: input, shape index: {}]   ;;  %s2453_s5 = inlined_call_operand.hbm [shape: f32[8,64,128], index: 5, kind: output, shape index: {}]  }
   0x1   :  { %2463 = sst [smem:[#allocation22_spill]] %s2449_s1 }
   0x2   :  { %2464 = sst [smem:[#allocation23_spill]] %s2451_s3 }
   0x3   :  { %2465 = sst [smem:[#allocation24_spill]] %s2453_s5 }
   0x4   :  { %10 = vsyncpa [#allocation3], 0 }
   0x5   :  { %12 = vsyncpa [#allocation3 + $0x1], 0 }
   0x6   :  { %13 = vsyncpa [#allocation6], 0 }
   0x7   :  { %15 = vsyncpa [#allocation6 + $0x1], 0 }
   0x8   :  { %16 = vsyncpa [#allocation9], 0 }
   0x9   :  { %18 = vsyncpa [#allocation9 + $0x1], 0 }
   0xa   :  { %19 = vsyncpa [#allocation4], 0 }
   0xb   :  { %21 = vsyncpa [#allocation4 + $0x1], 0  ;;  %s2075_s18 = smov 0   ;;  %s2077_s19 = smov 0  }
   0xc   :  { %s2079_s20 = smov 0   ;;  %s2081_s21 = smov 0  }
   0xd   :  { %s2083_s22 = smov 0   ;;  %s2085_s23 = smov 0  }
   0xe LB: > { %2466 = sst [smem:[#allocation16_spill]] %s2010_s18  ;;  %s2106_s24 = sadd.s32 4294967295, %s2030_s23   ;;  %s2030_s23 = sphi %s2085_s23, %s27_s23   ;;  %s2026_s22 = sphi %s2083_s22, %s2494_s22   ;;  %s2022_s21 = sphi %s2081_s21, %s2493_s21   ;;  %s2018_s20 = sphi %s2079_s20, %s2492_s20   ;;  %s2014_s19 = sphi %s2077_s19, %s2491_s19   ;;  %s2010_s18 = sphi %s2075_s18, %s2490_s18  }
   0xf   : > { %2467 = sst [smem:[#allocation17_spill]] %s2018_s20  ;;  %s1448_s25 = sadd.s32 4294967294, %s2030_s23  }
  0x10   : > { %2468 = sst [smem:[#allocation18_spill]] %s2030_s23  ;;  %s39_s26 = sadd.s32 1, %s2026_s22 }
  0x11   : > { %s48_s27 = sadd.s32 1, %s2018_s20  ;;  %p41_p0 = scmp.ge.s32.totalorder %s39_s26, 8 }
  0x12   : > { %p55_p1 = scmp.ne.s32.totalorder %s2018_s20, %s2014_s19  ;;  %p56_p2 = scmp.eq.s32.totalorder %s2030_s23, 0 }
  0x13   : > { %p61_p3 = scmp.ne.s32.totalorder %s2014_s19, %s2010_s18  ;;  %s2496_s26 = smov (%p41_p0, %s39_s26), 0 }
  0x14   : > { %2469 = sst [smem:[#allocation19_spill]] %s2496_s26  ;;  %p2118_p4 = por %p56_p2, %p55_p1 }
  0x15   : > { %p62_p5 = scmp.eq.s32.totalorder %s2106_s24, 0  ;;  %s43_s29 = ssub.s32 %s2026_s22, %s2496_s26 }
  0x16   : > { %p191_p6 = scmp.eq.s32.totalorder %s2106_s24, 7  ;;  %p46_p7 = scmp.eq.s32.totalorder %s43_s29, 0 }
  0x17   : > { %p2126_p8 = por %p62_p5, %p61_p3  ;;  %p197_p10 = scmp.eq.s32.totalorder %s1448_s25, 7 }
  0x18   : > { %p2130_p9 = por %p191_p6, %p55_p1  ;;  %p1661_p12 = scmp.lt.s32.totalorder %s2030_s23, 8 }
  0x19   : > { %s2135_s7 = scalar_select %p46_p7, %s2018_s20, %s48_s27  }
  0x1a   : > { %p2137_p11 = por %p197_p10, %p61_p3  ;;  %s2143_s9 = sand.u32 1, %s2018_s20  }
  0x1b   : > { %2473 = sst [smem:[#allocation20_spill]] %s2135_s7  ;;  %s2455_s10 = sand.u32 1, %s2030_s23  }
  0x1c   : > { %s2474_s8 = scalar_select %p2137_p11, 1, 0 }
  0x1d   : > { %s2454_s11 = sshll.u32 %s2143_s9, 8  ;;  %p2149_p13 = pnand %p1661_p12, %p2118_p4 }
  0x1e   : > { %2475 = sst [smem:[#allocation21_spill]] %s2474_s8  ;;  %s1545_s13 = sshll.u32 %s2026_s22, 12 }
  0x1f   : > { %s2477_s1 = sld [smem:[#allocation22_spill]]  ;;  %s244_s17 = scalar_lea.vmem [#allocation5], %s2454_s11 }
  0x20   : > { %s251_s25 = sshll.u32 %s244_s17, 4  ;;  %s2161_s27 = scalar_lea.sflag [#allocation6], %s2455_s10  ;;  %s252_s25 = int_to_ptr.vmem [resolvable:$true] %s251_s25 }
  0x21   : > { %p2165_p0 = pneg %p2149_p13  ;;  %s1815_s29 = scalar_lea.vmem %s252_s25, 4096 }
  0x22   : > { %p1816_p1 = scmp.ne.s32.totalorder %s252_s25, %s1815_s29  ;;  %s2032_s14 = smov [#allocation5]  }
  0x23   : > { %s1820_s15 = sshll.u32 %s2032_s14, 4  ;;  %s1821_s15 = int_to_ptr.vmem [resolvable:$false] %s1820_s15 }
  0x24   : > { %p1818_p2 = pnand %p1816_p1, %p2165_p0  ;;  %s1822_s11 = scalar_lea.vmem %s1821_s15, 8192 }
  0x25   : > { %s250_s16 = scalar_lea.hbm %s2477_s1, %s1545_s13  ;;  %p1823_p4 = scmp.lt.s32.totalorder %s252_s25, %s1821_s15 }
  0x26   : > { %p1819_p3 = pneg %p1818_p2  ;;  %p1824_p5 = scmp.lt.s32.totalorder %s1822_s11, %s1815_s29 }
  0x28   : > { %p1825_p6 = por %p1824_p5, %p1823_p4 }
  0x2a   : > { %p1826_p7 = pnand %p1825_p6, %p1819_p3 }
  0x2c   : > { %1829 = shalt.err (!%p1826_p7)
}
  0x2d   : > { %s2033_s17 = smov 256   ;;  %s2034_s10 = smov 16  }
  0x2e   : > { %1647 = dma.hbm_to_vmem [thread:$0]  (!%p2149_p13), %s250_s16, 4096, %s252_s25, %s2161_s27, %s2033_s17, %s2033_s17, %s2034_s10  }
  0x2f   : > { %p1464_p10 = scmp.ge.s32.totalorder %s2030_s23, 1  ;;  %p316_p12 = scmp.lt.s32.totalorder %s2030_s23, 9 }
  0x30   : > { %s2480_s3 = sld [smem:[#allocation23_spill]]  ;;  %s2481_s1 = sshll.u32 %s2143_s9, 8 }
  0x31   : > { %p2176_p1 = pnand %p1464_p10, %p316_p12  ;;  %s284_s26 = scalar_lea.vmem [#allocation8], %s2481_s1 }
  0x32   : > { %s291_s7 = sshll.u32 %s284_s26, 4  ;;  %s2482_s20 = sand.u32 1, %s2030_s23   ;;  %s292_s7 = int_to_ptr.vmem [resolvable:$true] %s291_s7 }
  0x33   : > { %s2187_s8 = scalar_lea.sflag [#allocation9], %s2482_s20  ;;  %s1843_s18 = scalar_lea.vmem %s292_s7, 4096 }
  0x34   : > { %p1844_p2 = scmp.ne.s32.totalorder %s292_s7, %s1843_s18  ;;  %s2035_s10 = smov [#allocation8]  }
  0x35   : > { %s1848_s16 = sshll.u32 %s2035_s10, 4  ;;  %s1849_s16 = int_to_ptr.vmem [resolvable:$false] %s1848_s16 }
  0x36   : > { %s290_s15 = scalar_lea.hbm %s2480_s3, %s1545_s13  ;;  %p1846_p3 = pnand %p1844_p2, %p2165_p0 }
  0x37   : > { %s1850_s25 = scalar_lea.vmem %s1849_s16, 8192  ;;  %p1851_p5 = scmp.lt.s32.totalorder %s292_s7, %s1849_s16 }
  0x38   : > { %p1847_p4 = pneg %p1846_p3  ;;  %p1852_p6 = scmp.lt.s32.totalorder %s1850_s25, %s1843_s18 }
  0x3a   : > { %p1853_p7 = por %p1852_p6, %p1851_p5 }
  0x3c   : > { %p1854_p10 = pnand %p1853_p7, %p1847_p4 }
  0x3e   : > { %1857 = shalt.err (!%p1854_p10)
}
  0x3f   : > { %s2036_s1 = smov 64   ;;  %s2037_s20 = smov 4  }
  0x40   : > { %1653 = dma.hbm_to_vmem [thread:$0]  (!%p2149_p13), %s290_s15, 4096, %s292_s7, %s2187_s8, %s2036_s1, %s2036_s1, %s2037_s20  }
  0x41   : > { %s1451_s26 = sshll.u32 %s2143_s9, 5  ;;  %s1544_s13 = sshll.u32 %s2026_s22, 9 }
  0x42   : > { %s229_s18 = scalar_lea.hbm %s2448_s0, %s1544_s13  ;;  %s221_s29 = scalar_lea.vmem [#allocation2], %s1451_s26 }
  0x43   : > { %s230_s10 = sshll.u32 %s221_s29, 4  ;;  %s1457_s16 = sshll.u32 %s2143_s9, 2  ;;  %s231_s10 = int_to_ptr.vmem [resolvable:$true] %s230_s10 }
  0x44   : > { %s218_s25 = scalar_lea.sflag [#allocation3], %s2143_s9  ;;  %s1871_s3 = scalar_lea.vmem %s231_s10, 512 }
  0x45   : > { %p1872_p12 = scmp.ne.s32.totalorder %s231_s10, %s1871_s3  ;;  %s2038_s23 = smov [#allocation2]  }
  0x46   : > { %s1876_s5 = sshll.u32 %s2038_s23, 4  ;;  %s1877_s5 = int_to_ptr.vmem [resolvable:$false] %s1876_s5 }
  0x47   : > { %p1874_p2 = pnand %p1872_p12, %p2165_p0  ;;  %s1878_s7 = scalar_lea.vmem %s1877_s5, 1024 }
  0x48   : > { %p1879_p4 = scmp.lt.s32.totalorder %s231_s10, %s1877_s5  ;;  %p1880_p5 = scmp.lt.s32.totalorder %s1878_s7, %s1871_s3 }
  0x49   : > { %p1875_p3 = pneg %p1874_p2 }
  0x4a   : > { %p1881_p6 = por %p1880_p5, %p1879_p4 }
  0x4c   : > { %p1882_p7 = pnand %p1881_p6, %p1875_p3 }
  0x4e   : > { %1885 = shalt.err (!%p1882_p7)
}
  0x4f   : > { %1644 = dma.hbm_to_vmem [thread:$0]  (!%p2149_p13), %s229_s18, 512, %s231_s10, %s218_s25, %s2036_s1, %s2036_s1, %s2037_s20  }
  0x50   : > { %s1546_s15 = sshll.u32 %s2026_s22, 6  ;;  %s265_s11 = scalar_lea.vmem [#allocation7], %s1457_s16 }
  0x51   : > { %s271_s17 = scalar_lea.hbm %s2450_s2, %s1546_s15  ;;  %s273_s29 = sshll.u32 %s265_s11, 4  ;;  %s274_s29 = int_to_ptr.vmem [resolvable:$true] %s273_s29 }
  0x52   : > { %s1899_s23 = scalar_lea.vmem %s274_s29, 64  ;;  %s2039_s3 = smov [#allocation7]  }
  0x53   : > { %p1900_p10 = scmp.ne.s32.totalorder %s274_s29, %s1899_s23  ;;  %s1904_s5 = sshll.u32 %s2039_s3, 4  ;;  %s1905_s5 = int_to_ptr.vmem [resolvable:$false] %s1904_s5 }
  0x54   : > { %s1906_s7 = scalar_lea.vmem %s1905_s5, 128  ;;  %p1907_p3 = scmp.lt.s32.totalorder %s274_s29, %s1905_s5 }
  0x55   : > { %p1902_p12 = pnand %p1900_p10, %p2165_p0  ;;  %p1908_p4 = scmp.lt.s32.totalorder %s1906_s7, %s1899_s23 }
  0x57   : > { %p1903_p2 = pneg %p1902_p12  ;;  %p1909_p5 = por %p1908_p4, %p1907_p3 }
  0x59   : > { %p1910_p6 = pnand %p1909_p5, %p1903_p2 }
  0x5b   : > { %1913 = shalt.err (!%p1910_p6)
}
  0x5c   : > { %1650 = dma.hbm_to_vmem [thread:$0]  (!%p2149_p13), %s271_s17, 64, %s274_s29, %s2161_s27  }
  0x5d   : > { %s1463_s1 = sshll.u32 %s2026_s22, 4  ;;  %s304_s20 = scalar_lea.vmem [#allocation10], %s2143_s9 }
  0x5e   : > { %s311_s18 = sshll.u32 %s304_s20, 4  ;;  %s309_s25 = scalar_lea.hbm %s2452_s4, %s1463_s1  ;;  %s312_s18 = int_to_ptr.vmem [resolvable:$true] %s311_s18 }
  0x5f   : > { %s1927_s15 = scalar_lea.vmem %s312_s18, 16  ;;  %s2040_s26 = smov [#allocation10]  }
  0x60   : > { %p1928_p7 = scmp.ne.s32.totalorder %s312_s18, %s1927_s15  ;;  %s1932_s13 = sshll.u32 %s2040_s26, 4  ;;  %s1933_s13 = int_to_ptr.vmem [resolvable:$false] %s1932_s13 }
  0x61   : > { %s1934_s11 = scalar_lea.vmem %s1933_s13, 32  ;;  %p1935_p2 = scmp.lt.s32.totalorder %s312_s18, %s1933_s13 }
  0x62   : > { %p1930_p10 = pnand %p1928_p7, %p2165_p0  ;;  %p1936_p3 = scmp.lt.s32.totalorder %s1934_s11, %s1927_s15 }
  0x64   : > { %p1931_p12 = pneg %p1930_p10  ;;  %p1937_p4 = por %p1936_p3, %p1935_p2 }
  0x66   : > { %p1938_p5 = pnand %p1937_p4, %p1931_p12 }
  0x68   : > { %1941 = shalt.err (!%p1938_p5)
}
  0x69   : > { %1656 = dma.hbm_to_vmem [thread:$0]  (!%p2149_p13), %s309_s25, 16, %s312_s18, %s2187_s8  }
  0x6a   : > { %320 = sbr.rel (%p2176_p1) target bundleno = 601 (0x259), region = 40  ;;  %s2227_s9 = sand.u32 (!%p2176_p1), 1, %s2014_s19  }
  0x6b   : > { %s1465_s27 = sshll.u32 (!%p2176_p1), %s2227_s9, 5  ;;  %s323_s28 = scalar_lea.sflag (!%p2176_p1), [#allocation3], %s2227_s9 }
  0x6c   : > { %s2231_s17 = scalar_lea.vmem (!%p2176_p1), [#allocation2], %s1465_s27 }
  0x6f   : > { %1993 = dma.done.wait (%p2126_p8), %s323_s28, 512  }
  0x70   : > { %1995 = vsyncadd (%p2126_p8), %s323_s28, 4294966784  ;;  %s331_s8 = sand.u32 1, %s2106_s24   ;;  %s1466_s12 = sshll.u32 %s2227_s9, 8 }
  0x71   : > { %s332_s14 = scalar_lea.sflag [#allocation6], %s331_s8  ;;  %s2239_s29 = scalar_lea.vmem [#allocation5], %s1466_s12 }
  0x72   : > { %1997 = dma.done.wait (%p2126_p8), %s332_s14, 4160  }
  0x73   : > { %1999 = vsyncadd (%p2126_p8), %s332_s14, 4294963136  ;;  %s1467_s23 = sshll.u32 %s2227_s9, 2  ;;  %s350_s5 = scalar_lea.sflag [#allocation9], %s331_s8 }
  0x74   : > { %s2246_s3 = scalar_lea.vmem [#allocation7], %s1467_s23  ;;  %s2248_s7 = scalar_lea.vmem [#allocation8], %s1466_s12 }
  0x75   : > { %2001 = dma.done.wait (%p2126_p8), %s350_s5, 4112  }
  0x76   : > { %2003 = vsyncadd (%p2126_p8), %s350_s5, 4294963184  ;;  %v2041_v0 = vmov 0   ;;  %v1718_v1 = vld [vmem:[%s2239_s29 + $0xe4] ss:$16 sps:$4 sm:$0xff]   ;;  %v1720_v2 = vld [vmem:[%s2239_s29 + $0xec] ss:$16 sps:$4 sm:$0xff]  }
  0x77   : > { %582 = vmatprep.mubr.bf16.mxu0 %v2041_v0  ;;  %819 = vmatprep.mubr.bf16.mxu1 %v2041_v0  ;;  %v1722_v3 = vld [vmem:[%s2239_s29 + $0xe0] ss:$16 sps:$4 sm:$0xff]   ;;  %v1723_v4 = vld [vmem:[%s2239_s29 + $0xe8] ss:$16 sps:$4 sm:$0xff]   ;;  %v1724_v5 = vld [vmem:[%s2239_s29 + $0xc4] ss:$16 sps:$4 sm:$0xff]  }
  0x78   : > { %550 = vmatprep.subr.bf16.mxu0 %v1718_v1  ;;  %787 = vmatprep.subr.bf16.mxu1 %v1720_v2  ;;  %v1726_v6 = vld [vmem:[%s2239_s29 + $0xcc] ss:$16 sps:$4 sm:$0xff]   ;;  %v1728_v7 = vld [vmem:[%s2239_s29 + $0xc0] ss:$16 sps:$4 sm:$0xff]   ;;  %v1729_v8 = vld [vmem:[%s2239_s29 + $0xc8] ss:$16 sps:$4 sm:$0xff]  }
  0x79   : > { %551 = vmatpush1.bf16.msra.mxu0 %v1722_v3  ;;  %788 = vmatpush1.bf16.msra.mxu1 %v1723_v4  ;;  %v1730_v9 = vld [vmem:[%s2239_s29 + $0xa4] ss:$16 sps:$4 sm:$0xff]   ;;  %v1732_v10 = vld [vmem:[%s2239_s29 + $0xac] ss:$16 sps:$4 sm:$0xff]   ;;  %v1734_v11 = vld [vmem:[%s2239_s29 + $0xa0] ss:$16 sps:$4 sm:$0xff]  }
  0x7a   : > { %552 = vmatprep.subr.bf16.mxu0 %v1724_v5  ;;  %789 = vmatprep.subr.bf16.mxu1 %v1726_v6  ;;  %v1735_v12 = vld [vmem:[%s2239_s29 + $0xa8] ss:$16 sps:$4 sm:$0xff]   ;;  %v1736_v13 = vld [vmem:[%s2239_s29 + $0x84] ss:$16 sps:$4 sm:$0xff]   ;;  %v1738_v14 = vld [vmem:[%s2239_s29 + $0x8c] ss:$16 sps:$4 sm:$0xff]   ;;  %v436_v5 = vlaneseq }
  0x7b   : > { %v1740_v15 = vld [vmem:[%s2239_s29 + $0x80] ss:$16 sps:$4 sm:$0xff]   ;;  %v1741_v16 = vld [vmem:[%s2239_s29 + $0x88] ss:$16 sps:$4 sm:$0xff]   ;;  %v1742_v17 = vld [vmem:[%s2239_s29 + $0x64] ss:$16 sps:$4 sm:$0xff]  }
  0x7c   : > { %v1744_v18 = vld [vmem:[%s2239_s29 + $0x6c] ss:$16 sps:$4 sm:$0xff]   ;;  %v1746_v19 = vld [vmem:[%s2239_s29 + $0x60] ss:$16 sps:$4 sm:$0xff]   ;;  %v1747_v20 = vld [vmem:[%s2239_s29 + $0x68] ss:$16 sps:$4 sm:$0xff]  }
  0x7d   : > { %553 = vmatpush1.bf16.msra.mxu0 %v1728_v7  ;;  %790 = vmatpush1.bf16.msra.mxu1 %v1729_v8  ;;  %v1748_v21 = vld [vmem:[%s2239_s29 + $0x44] ss:$16 sps:$4 sm:$0xff]   ;;  %v1750_v22 = vld [vmem:[%s2239_s29 + $0x4c] ss:$16 sps:$4 sm:$0xff]   ;;  %v1752_v23 = vld [vmem:[%s2239_s29 + $0x40] ss:$16 sps:$4 sm:$0xff]  }
  0x7e   : > { %554 = vmatprep.subr.bf16.mxu0 %v1730_v9  ;;  %791 = vmatprep.subr.bf16.mxu1 %v1732_v10  ;;  %v1753_v24 = vld [vmem:[%s2239_s29 + $0x48] ss:$16 sps:$4 sm:$0xff]   ;;  %v1754_v25 = vld [vmem:[%s2239_s29 + $0x24] ss:$16 sps:$4 sm:$0xff]   ;;  %v1756_v26 = vld [vmem:[%s2239_s29 + $0x2c] ss:$16 sps:$4 sm:$0xff]  }
  0x7f   : > { %v1758_v27 = vld [vmem:[%s2239_s29 + $0x20] ss:$16 sps:$4 sm:$0xff]   ;;  %v1759_v28 = vld [vmem:[%s2239_s29 + $0x28] ss:$16 sps:$4 sm:$0xff]   ;;  %v1760_v29 = vld [vmem:[%s2239_s29 + $0x4] ss:$16 sps:$4 sm:$0xff]  }
  0x80   : > { %v1762_v30 = vld [vmem:[%s2239_s29 + $0xc] ss:$16 sps:$4 sm:$0xff]   ;;  %v1764_v31 = vld [vmem:[%s2239_s29] ss:$16 sps:$4 sm:$0xff]   ;;  %v1765_v32 = vld [vmem:[%s2239_s29 + $0x8] ss:$16 sps:$4 sm:$0xff]  }
  0x81   : > { %555 = vmatpush1.bf16.msra.mxu0 %v1734_v11  ;;  %792 = vmatpush1.bf16.msra.mxu1 %v1735_v12  ;;  %v1770_v33 = vld [vmem:[%s2248_s7 + $0xf8] sm:$0xff]   ;;  %v1774_v38 = vld [vmem:[%s2248_s7 + $0xf0] sm:$0xff]   ;;  %v1767_v42 = vld [vmem:[%s2231_s17 + $0x8] sm:$0xff]   ;;  %v437_v6 = vshrl.u32 %v436_v5, 7  ;;  %s1469_s24 = sshll.u32 %s2227_s9, 6  ;;  %s361_s30 = scalar_lea.vmem [#allocation10], %s2227_s9 }
  0x82   : > { %556 = vmatprep.subr.bf16.mxu0 %v1736_v13  ;;  %793 = vmatprep.subr.bf16.mxu1 %v1738_v14  ;;  %v1771_v34 = vld [vmem:[%s2248_s7 + $0x78] sm:$0xff]   ;;  %v1775_v39 = vld [vmem:[%s2248_s7 + $0x70] sm:$0xff]   ;;  %v1778_v43 = vld [vmem:[%s2248_s7 + $0xe8] sm:$0xff]   ;;  %s2377_s1 = scalar_lea.vmem [#allocation11], %s1469_s24  ;;  %s1548_s20 = sshll.u32 %s2022_s21, 10 }
  0x83   : > { %v1766_v35 = vld [vmem:[%s2231_s17] sm:$0xff]   ;;  %v1776_v40 = vld [vmem:[%s2248_s7 + $0xb0] sm:$0xff]   ;;  %v1779_v44 = vld [vmem:[%s2248_s7 + $0x68] sm:$0xff]   ;;  %v442_v7 = vsub.s32 1, %v437_v6  ;;  %v438_v8 = vsub.s32 0, %v437_v6  ;;  %s1277_s18 = sshll.u32 %s2377_s1, 4  ;;  %s2399_s18 = int_to_ptr.vmem [resolvable:$true] %s1277_s18 }
  0x84   : > { %v1772_v36 = vld [vmem:[%s2248_s7 + $0xb8] sm:$0xff]   ;;  %v1777_v41 = vld [vmem:[%s2248_s7 + $0x30] sm:$0xff]   ;;  %v1780_v45 = vld [vmem:[%s2248_s7 + $0xa8] sm:$0xff]   ;;  %s2483_s25 = sld [smem:[#allocation24_spill]]  ;;  %s1262_s26 = scalar_lea.sflag [#allocation4], %s2227_s9 }
  0x85   : > { %557 = vmatpush1.bf16.msra.mxu0 %v1740_v15  ;;  %794 = vmatpush1.bf16.msra.mxu1 %v1741_v16  ;;  %v1773_v37 = vld [vmem:[%s2248_s7 + $0x38] sm:$0xff]   ;;  %v1781_v46 = vld [vmem:[%s2248_s7 + $0x28] sm:$0xff]   ;;  %v1782_v47 = vld [vmem:[%s2248_s7 + $0xe0] sm:$0xff]   ;;  %s1942_s13 = scalar_lea.vmem %s2399_s18, 1024  ;;  %s2042_s21 = smov [#allocation11]  }
  0x86   : > { %558 = vmatprep.subr.bf16.mxu0 %v1742_v17  ;;  %795 = vmatprep.subr.bf16.mxu1 %v1744_v18  ;;  %v1783_v48 = vld [vmem:[%s2248_s7 + $0x60] sm:$0xff]   ;;  %v1768_v51 = vld [vmem:[%s2231_s17 + $0x10] sm:$0xff]   ;;  %v1786_v52 = vld [vmem:[%s2248_s7 + $0xd8] sm:$0xff]   ;;  %p1943_p8 = scmp.ne.s32.totalorder %s2399_s18, %s1942_s13  ;;  %s1946_s11 = sshll.u32 %s2042_s21, 4  ;;  %s1947_s11 = int_to_ptr.vmem [resolvable:$false] %s1946_s11 }
  0x87   : > { %v1784_v49 = vld [vmem:[%s2248_s7 + $0xa0] sm:$0xff]   ;;  %v1787_v53 = vld [vmem:[%s2248_s7 + $0x58] sm:$0xff]   ;;  %v1769_v56 = vld [vmem:[%s2231_s17 + $0x18] sm:$0xff]   ;;  %s1948_s27 = scalar_lea.vmem %s1947_s11, 2048  ;;  %p1949_p1 = scmp.lt.s32.totalorder %s2399_s18, %s1947_s11 }
  0x88   : > { %v1785_v50 = vld [vmem:[%s2248_s7 + $0x20] sm:$0xff]   ;;  %v1788_v54 = vld [vmem:[%s2248_s7 + $0x98] sm:$0xff]   ;;  %v1790_v57 = vld [vmem:[%s2248_s7 + $0xd0] sm:$0xff]   ;;  %p1944_p13 = pnand %p1943_p8, %p2130_p9  ;;  %p1950_p6 = scmp.lt.s32.totalorder %s1948_s27, %s1942_s13 }
  0x89   : > { %559 = vmatpush1.bf16.msra.mxu0 %v1746_v19  ;;  %796 = vmatpush1.bf16.msra.mxu1 %v1747_v20  ;;  %v1789_v55 = vld [vmem:[%s2248_s7 + $0x18] sm:$0xff]   ;;  %v1791_v58 = vld [vmem:[%s2248_s7 + $0x50] sm:$0xff]   ;;  %v1794_v61 = vld [vmem:[%s2248_s7 + $0xc8] sm:$0xff]  }
  0x8a   : > { %560 = vmatprep.subr.bf16.mxu0 %v1748_v21  ;;  %797 = vmatprep.subr.bf16.mxu1 %v1750_v22  ;;  %v1792_v59 = vld [vmem:[%s2248_s7 + $0x90] sm:$0xff]   ;;  %v1795_v62 = vld [vmem:[%s2248_s7 + $0x48] sm:$0xff]   ;;  %v1798_v1 = vld [vmem:[%s2248_s7 + $0xc0] sm:$0xff]   ;;  %s2397_s15 = scalar_lea.hbm %s2483_s25, %s1548_s20  ;;  %p1945_p0 = pneg %p1944_p13 }
  0x8b   : > { %v1793_v60 = vld [vmem:[%s2248_s7 + $0x10] sm:$0xff]   ;;  %v1796_v63 = vld [vmem:[%s2248_s7 + $0x88] sm:$0xff]   ;;  %v1799_v2 = vld [vmem:[%s2248_s7 + $0x40] sm:$0xff]   ;;  %p1951_p7 = por %p1950_p6, %p1949_p1 }
  0x8c   : > { %v1800_v3 = vld [vmem:[%s2248_s7 + $0x80] sm:$0xff]   ;;  %v434_v9 = vld [vmem:[%s2246_s3] sm:$0x3]  ;;  %v695_v10 = vld [vmem:[%s2246_s3 + $0x2] sm:$0x3] }
  0x8d   : > { %561 = vmatpush1.bf16.msra.mxu0 %v1752_v23  ;;  %798 = vmatpush1.bf16.msra.mxu1 %v1753_v24  ;;  %v1801_v4 = vld [vmem:[%s2248_s7] sm:$0xff]   ;;  %v2332_v13 = vrot.slane %v434_v9, %v442_v7  ;;  %v2334_v14 = vrot.slane %v695_v10, %v442_v7  ;;  %v2336_v15 = vrot.slane %v434_v9, %v438_v8  ;;  %p1952_p10 = pnand %p1951_p7, %p1945_p0 }
  0x8e   : > { %562 = vmatprep.subr.bf16.mxu0 %v1754_v25  ;;  %799 = vmatprep.subr.bf16.mxu1 %v1756_v26  ;;  %v2338_v16 = vrot.slane %v695_v10, %v438_v8 }
  0x91   : > { %563 = vmatpush1.bf16.msra.mxu0 %v1758_v27  ;;  %800 = vmatpush1.bf16.msra.mxu1 %v1759_v28 }
  0x92   : > { %564 = vmatprep.subr.bf16.mxu0 %v1760_v29  ;;  %801 = vmatprep.subr.bf16.mxu1 %v1762_v30 }
  0x95   : > { %565 = vmatpush1.bf16.msra.mxu0 %v1764_v31  ;;  %802 = vmatpush1.bf16.msra.mxu1 %v1765_v32 }
  0x96   : > { %1549 = vmatprep.subr.bf16.mxu0 %v1770_v33  ;;  %1589 = vmatprep.subr.bf16.mxu1 %v1771_v34 }
  0x98   : > { %583 = vmatmul.mubr.bf16.vlgmr.msra.gmra.mxu0 %v1766_v35  ;;  %820 = vmatmul.mubr.bf16.vlgmr.msra.gmra.mxu1 %v1766_v35 }
  0x99   : > { %592 = vmatprep.mubr.bf16.mxu0 %v2041_v0  ;;  %829 = vmatprep.mubr.bf16.mxu1 %v2041_v0 }
  0x9a   : > { %1550 = vmatpush3.bf16.msra.mxu0 %v1772_v36  ;;  %1590 = vmatpush3.bf16.msra.mxu1 %v1773_v37 }
  0x9b   : > { %1551 = vmatprep.subr.bf16.mxu0 %v1774_v38  ;;  %1591 = vmatprep.subr.bf16.mxu1 %v1775_v39 }
  0x9e   : > { %1552 = vmatpush3.bf16.msra.mxu0 %v1776_v40  ;;  %1592 = vmatpush3.bf16.msra.mxu1 %v1777_v41 }
  0x9f   : > { %1553 = vmatprep.subr.bf16.mxu0 %v1778_v43  ;;  %1593 = vmatprep.subr.bf16.mxu1 %v1779_v44 }
  0xa0   : > { %593 = vmatmul.mubr.bf16.gmra.mxu0 %v1767_v42  ;;  %830 = vmatmul.mubr.bf16.gmra.mxu1 %v1767_v42 }
  0xa1   : > { %602 = vmatprep.mubr.bf16.mxu0 %v2041_v0  ;;  %839 = vmatprep.mubr.bf16.mxu1 %v2041_v0 }
  0xa2   : > { %1554 = vmatpush3.bf16.msra.mxu0 %v1780_v45  ;;  %1594 = vmatpush3.bf16.msra.mxu1 %v1781_v46 }
  0xa3   : > { %1555 = vmatprep.subr.bf16.mxu0 %v1782_v47  ;;  %1595 = vmatprep.subr.bf16.mxu1 %v1783_v48 }
  0xa6   : > { %1556 = vmatpush3.bf16.msra.mxu0 %v1784_v49  ;;  %1596 = vmatpush3.bf16.msra.mxu1 %v1785_v50 }
  0xa7   : > { %1557 = vmatprep.subr.bf16.mxu0 %v1786_v52  ;;  %1597 = vmatprep.subr.bf16.mxu1 %v1787_v53 }
  0xa8   : > { %603 = vmatmul.mubr.bf16.gmra.mxu0 %v1768_v51  ;;  %840 = vmatmul.mubr.bf16.gmra.mxu1 %v1768_v51 }
  0xa9   : > { %612 = vmatprep.mubr.bf16.mxu0 %v2041_v0  ;;  %849 = vmatprep.mubr.bf16.mxu1 %v2041_v0  ;;  %v1797_v0 = vld [vmem:[%s2248_s7 + $0x8] sm:$0xff]  }
  0xaa   : > { %1558 = vmatpush3.bf16.msra.mxu0 %v1788_v54  ;;  %1598 = vmatpush3.bf16.msra.mxu1 %v1789_v55 }
  0xab   : > { %1559 = vmatprep.subr.bf16.mxu0 %v1790_v57  ;;  %1599 = vmatprep.subr.bf16.mxu1 %v1791_v58 }
  0xae   : > { %1560 = vmatpush3.bf16.msra.mxu0 %v1792_v59  ;;  %1600 = vmatpush3.bf16.msra.mxu1 %v1793_v60 }
  0xaf   : > { %1561 = vmatprep.subr.bf16.mxu0 %v1794_v61  ;;  %1601 = vmatprep.subr.bf16.mxu1 %v1795_v62 }
  0xb0   : > { %613 = vmatmul.mubr.bf16.gmra.mxu0 %v1769_v56  ;;  %850 = vmatmul.mubr.bf16.gmra.mxu1 %v1769_v56 }
  0xb2   : > { %1562 = vmatpush3.bf16.msra.mxu0 %v1796_v63  ;;  %1602 = vmatpush3.bf16.msra.mxu1 %v1797_v0 }
  0xb3   : > { %1563 = vmatprep.subr.bf16.mxu0 %v1798_v1  ;;  %1603 = vmatprep.subr.bf16.mxu1 %v1799_v2 }
  0xb6   : > { %1564 = vmatpush3.bf16.msra.mxu0 %v1800_v3  ;;  %1604 = vmatpush3.bf16.msra.mxu1 %v1801_v4 }
 0x158   : > { %v584_v11 = vpop.f32.mrf.mxu0  ;;  %v821_v12 = vpop.f32.mrf.mxu1 }
 0x159   : > { %v585_v25 = vadd.f32 %v584_v11, %v2336_v15  ;;  %v822_v26 = vadd.f32 %v821_v12, %v2338_v16 }
 0x15a   : > { %v586_v17 = vpop.f32.mrf.mxu0  ;;  %v823_v18 = vpop.f32.mrf.mxu1 }
 0x15b   : > { %v587_v21 = vadd.f32 %v586_v17, %v2332_v13  ;;  %v824_v22 = vadd.f32 %v823_v18, %v2334_v14  ;;  %v623_v39 = vmax.f32 %v585_v25, 0.0  ;;  %v860_v40 = vmax.f32 %v822_v26, 0.0 }
 0x15c   : > { %v588_v19 = vpop.f32.mrf.mxu0  ;;  %v825_v20 = vpop.f32.mrf.mxu1 }
 0x15d   : > { %v589_v23 = vadd.f32 %v588_v19, %v2336_v15  ;;  %v826_v24 = vadd.f32 %v825_v20, %v2338_v16  ;;  %v624_v35 = vmax.f32 %v587_v21, 0.0  ;;  %v861_v36 = vmax.f32 %v824_v22, 0.0 }
 0x15e   : > { %v590_v27 = vpop.f32.mrf.mxu0  ;;  %v827_v28 = vpop.f32.mrf.mxu1 }
 0x15f   : > { %v591_v29 = vadd.f32 %v590_v27, %v2332_v13  ;;  %v828_v30 = vadd.f32 %v827_v28, %v2334_v14  ;;  %v625_v31 = vmax.f32 %v589_v23, 0.0  ;;  %v862_v32 = vmax.f32 %v826_v24, 0.0 }
 0x160   : > { %v594_v33 = vpop.f32.mrf.mxu0  ;;  %v831_v34 = vpop.f32.mrf.mxu1 }
 0x161   : > { %v626_v37 = vmax.f32 %v591_v29, 0.0  ;;  %v863_v38 = vmax.f32 %v828_v30, 0.0  ;;  %v639_v45 = vpack.c.bf16 %v625_v31, %v623_v39  ;;  %v876_v46 = vpack.c.bf16 %v862_v32, %v860_v40 }
 0x162   : > { %v596_v41 = vpop.f32.mrf.mxu0  ;;  %v833_v42 = vpop.f32.mrf.mxu1  ;;  %v595_v53 = vadd.f32 %v594_v33, %v2336_v15  ;;  %v832_v54 = vadd.f32 %v831_v34, %v2338_v16 }
 0x163   : > { %v640_v43 = vpack.c.bf16 %v626_v37, %v624_v35  ;;  %v877_v44 = vpack.c.bf16 %v863_v38, %v861_v36  ;;  %v597_v47 = vadd.f32 %v596_v41, %v2332_v13  ;;  %v834_v50 = vadd.f32 %v833_v42, %v2334_v14 }
 0x164   : > { %v598_v48 = vpop.f32.mrf.mxu0  ;;  %v835_v49 = vpop.f32.mrf.mxu1  ;;  %v627_v3 = vmax.f32 %v595_v53, 0.0  ;;  %v864_v4 = vmax.f32 %v832_v54, 0.0 }
 0x165   : > { %v599_v51 = vadd.f32 %v598_v48, %v2336_v15  ;;  %v836_v52 = vadd.f32 %v835_v49, %v2338_v16  ;;  %1044 = vmatprep.mubr.bf16.mxu0 %v877_v44  ;;  %1205 = vmatprep.mubr.bf16.mxu1 %v640_v43  ;;  %v628_v63 = vmax.f32 %v597_v47, 0.0  ;;  %v865_v0 = vmax.f32 %v834_v50, 0.0 }
 0x166   : > { %v600_v55 = vpop.f32.mrf.mxu0  ;;  %v837_v56 = vpop.f32.mrf.mxu1  ;;  %1045 = vmatmul.mubr.bf16.vlgmr.msra.gmra.mxu0 %v876_v46  ;;  %1206 = vmatmul.mubr.bf16.vlgmr.msra.gmra.mxu1 %v639_v45 }
 0x167   : > { %v601_v57 = vadd.f32 %v600_v55, %v2332_v13  ;;  %v838_v58 = vadd.f32 %v837_v56, %v2334_v14  ;;  %v629_v59 = vmax.f32 %v599_v51, 0.0  ;;  %v866_v60 = vmax.f32 %v836_v52, 0.0 }
 0x168   : > { %v604_v61 = vpop.f32.mrf.mxu0  ;;  %v841_v62 = vpop.f32.mrf.mxu1 }
 0x169   : > { %v630_v1 = vmax.f32 %v601_v57, 0.0  ;;  %v867_v2 = vmax.f32 %v838_v58, 0.0  ;;  %v641_v9 = vpack.c.bf16 %v629_v59, %v627_v3  ;;  %v878_v10 = vpack.c.bf16 %v866_v60, %v864_v4 }
 0x16a   : > { %v606_v5 = vpop.f32.mrf.mxu0  ;;  %v843_v6 = vpop.f32.mrf.mxu1  ;;  %v605_v21 = vadd.f32 %v604_v61, %v2336_v15  ;;  %v842_v22 = vadd.f32 %v841_v62, %v2338_v16 }
 0x16b   : > { %v642_v7 = vpack.c.bf16 %v630_v1, %v628_v63  ;;  %v879_v8 = vpack.c.bf16 %v867_v2, %v865_v0  ;;  %v607_v11 = vadd.f32 %v606_v5, %v2332_v13  ;;  %v844_v18 = vadd.f32 %v843_v6, %v2334_v14  ;;  %v2374_v5 = vld [vmem:[%s361_s30] ss:$0 sm:$0xff] }
 0x16c   : > { %v608_v12 = vpop.f32.mrf.mxu0  ;;  %v845_v17 = vpop.f32.mrf.mxu1  ;;  %v631_v35 = vmax.f32 %v605_v21, 0.0  ;;  %v868_v36 = vmax.f32 %v842_v22, 0.0 }
 0x16d   : > { %v609_v19 = vadd.f32 %v608_v12, %v2336_v15  ;;  %v846_v20 = vadd.f32 %v845_v17, %v2338_v16  ;;  %1052 = vmatprep.mubr.bf16.mxu0 %v879_v8  ;;  %1213 = vmatprep.mubr.bf16.mxu1 %v642_v7  ;;  %v632_v31 = vmax.f32 %v607_v11, 0.0  ;;  %v869_v32 = vmax.f32 %v844_v18, 0.0 }
 0x16e   : > { %v610_v23 = vpop.f32.mrf.mxu0  ;;  %v847_v24 = vpop.f32.mrf.mxu1  ;;  %1053 = vmatmul.mubr.bf16.gmra.mxu0 %v878_v10  ;;  %1214 = vmatmul.mubr.bf16.gmra.mxu1 %v641_v9 }
 0x16f   : > { %v611_v25 = vadd.f32 %v610_v23, %v2332_v13  ;;  %v848_v26 = vadd.f32 %v847_v24, %v2334_v14  ;;  %v633_v27 = vmax.f32 %v609_v19, 0.0  ;;  %v870_v28 = vmax.f32 %v846_v20, 0.0 }
 0x170   : > { %v614_v29 = vpop.f32.mrf.mxu0  ;;  %v851_v30 = vpop.f32.mrf.mxu1 }
 0x171   : > { %v634_v33 = vmax.f32 %v611_v25, 0.0  ;;  %v871_v34 = vmax.f32 %v848_v26, 0.0  ;;  %v643_v41 = vpack.c.bf16 %v633_v27, %v631_v35  ;;  %v880_v42 = vpack.c.bf16 %v870_v28, %v868_v36 }
 0x172   : > { %v616_v37 = vpop.f32.mrf.mxu0  ;;  %v853_v38 = vpop.f32.mrf.mxu1  ;;  %v615_v49 = vadd.f32 %v614_v29, %v2336_v15  ;;  %v852_v50 = vadd.f32 %v851_v30, %v2338_v16 }
 0x173   : > { %v644_v39 = vpack.c.bf16 %v634_v33, %v632_v31  ;;  %v881_v40 = vpack.c.bf16 %v871_v34, %v869_v32  ;;  %v617_v43 = vadd.f32 %v616_v37, %v2332_v13  ;;  %v854_v46 = vadd.f32 %v853_v38, %v2334_v14 }
 0x174   : > { %v618_v44 = vpop.f32.mrf.mxu0  ;;  %v855_v45 = vpop.f32.mrf.mxu1  ;;  %v635_v61 = vmax.f32 %v615_v49, 0.0  ;;  %v872_v62 = vmax.f32 %v852_v50, 0.0 }
 0x175   : > { %v619_v47 = vadd.f32 %v618_v44, %v2336_v15  ;;  %v856_v48 = vadd.f32 %v855_v45, %v2338_v16  ;;  %1060 = vmatprep.mubr.bf16.mxu0 %v881_v40  ;;  %1221 = vmatprep.mubr.bf16.mxu1 %v644_v39  ;;  %v636_v57 = vmax.f32 %v617_v43, 0.0  ;;  %v873_v58 = vmax.f32 %v854_v46, 0.0 }
 0x176   : > { %v620_v51 = vpop.f32.mrf.mxu0  ;;  %v857_v52 = vpop.f32.mrf.mxu1  ;;  %1061 = vmatmul.mubr.bf16.gmra.mxu0 %v880_v42  ;;  %1222 = vmatmul.mubr.bf16.gmra.mxu1 %v643_v41 }
 0x177   : > { %v621_v53 = vadd.f32 %v620_v51, %v2332_v13  ;;  %v858_v54 = vadd.f32 %v857_v52, %v2334_v14  ;;  %v637_v55 = vmax.f32 %v619_v47, 0.0  ;;  %v874_v56 = vmax.f32 %v856_v48, 0.0 }
 0x179   : > { %v638_v59 = vmax.f32 %v621_v53, 0.0  ;;  %v875_v60 = vmax.f32 %v858_v54, 0.0  ;;  %v645_v63 = vpack.c.bf16 %v637_v55, %v635_v61  ;;  %v882_v0 = vpack.c.bf16 %v874_v56, %v872_v62 }
 0x17b   : > { %v646_v15 = vpack.c.bf16 %v638_v59, %v636_v57  ;;  %v883_v16 = vpack.c.bf16 %v875_v60, %v873_v58 }
 0x17d   : > { %1068 = vmatprep.mubr.bf16.mxu0 %v883_v16  ;;  %1229 = vmatprep.mubr.bf16.mxu1 %v646_v15 }
 0x17e   : > { %1069 = vmatmul.mubr.bf16.gmra.mxu0 %v882_v0  ;;  %1230 = vmatmul.mubr.bf16.gmra.mxu1 %v645_v63 }
 0x226   : > { %v1565_v13 = vpop.f32.mrf.mxu0  ;;  %v1605_v14 = vpop.f32.mrf.mxu1 }
 0x228   : > { %v1566_v1 = vpop.f32.mrf.mxu0  ;;  %v1606_v2 = vpop.f32.mrf.mxu1 }
 0x229   : > { %v1567_v3 = vadd.f32 %v1566_v1, %v1565_v13  ;;  %v1607_v4 = vadd.f32 %v1606_v2, %v1605_v14 }
 0x22a   : > { %v1568_v6 = vpop.f32.mrf.mxu0  ;;  %v1608_v7 = vpop.f32.mrf.mxu1 }
 0x22b   : > { %v1208_v8 = vadd.f32 %v1607_v4, %v1567_v3 }
 0x22c   : > { %v1569_v9 = vpop.f32.mrf.mxu0  ;;  %v1609_v10 = vpop.f32.mrf.mxu1 }
 0x22d   : > { %v1245_v11 = vadd.f32 %v2374_v5, %v1208_v8  ;;  %v1570_v12 = vadd.f32 %v1569_v9, %v1568_v6  ;;  %v1610_v17 = vadd.f32 %v1609_v10, %v1608_v7 }
 0x22e   : > { %v1571_v18 = vpop.f32.mrf.mxu0  ;;  %v1611_v19 = vpop.f32.mrf.mxu1 }
 0x22f   : > { %1253 = vst [vmem:[%s2377_s1] sm:$0xff] %v1245_v11  ;;  %v1211_v20 = vadd.f32 %v1610_v17, %v1570_v12 }
 0x230   : > { %v1572_v21 = vpop.f32.mrf.mxu0  ;;  %v1612_v22 = vpop.f32.mrf.mxu1 }
 0x231   : > { %v1246_v23 = vadd.f32 %v2374_v5, %v1211_v20  ;;  %v1573_v24 = vadd.f32 %v1572_v21, %v1571_v18  ;;  %v1613_v25 = vadd.f32 %v1612_v22, %v1611_v19 }
 0x232   : > { %v1574_v26 = vpop.f32.mrf.mxu0  ;;  %v1614_v27 = vpop.f32.mrf.mxu1 }
 0x233   : > { %1254 = vst [vmem:[%s2377_s1 + $0x8] sm:$0xff] %v1246_v23  ;;  %v1216_v28 = vadd.f32 %v1613_v25, %v1573_v24 }
 0x234   : > { %v1575_v29 = vpop.f32.mrf.mxu0  ;;  %v1615_v30 = vpop.f32.mrf.mxu1 }
 0x235   : > { %v1247_v31 = vadd.f32 %v2374_v5, %v1216_v28  ;;  %v1576_v32 = vadd.f32 %v1575_v29, %v1574_v26  ;;  %v1616_v33 = vadd.f32 %v1615_v30, %v1614_v27 }
 0x236   : > { %v1577_v34 = vpop.f32.mrf.mxu0  ;;  %v1617_v35 = vpop.f32.mrf.mxu1 }
 0x237   : > { %1255 = vst [vmem:[%s2377_s1 + $0x10] sm:$0xff] %v1247_v31  ;;  %v1219_v36 = vadd.f32 %v1616_v33, %v1576_v32 }
 0x238   : > { %v1578_v37 = vpop.f32.mrf.mxu0  ;;  %v1618_v38 = vpop.f32.mrf.mxu1 }
 0x239   : > { %v1248_v39 = vadd.f32 %v2374_v5, %v1219_v36  ;;  %v1579_v40 = vadd.f32 %v1578_v37, %v1577_v34  ;;  %v1619_v41 = vadd.f32 %v1618_v38, %v1617_v35 }
 0x23a   : > { %v1580_v42 = vpop.f32.mrf.mxu0  ;;  %v1620_v43 = vpop.f32.mrf.mxu1 }
 0x23b   : > { %1256 = vst [vmem:[%s2377_s1 + $0x18] sm:$0xff] %v1248_v39  ;;  %v1224_v44 = vadd.f32 %v1619_v41, %v1579_v40 }
 0x23c   : > { %v1581_v45 = vpop.f32.mrf.mxu0  ;;  %v1621_v46 = vpop.f32.mrf.mxu1 }
 0x23d   : > { %v1249_v47 = vadd.f32 %v2374_v5, %v1224_v44  ;;  %v1582_v48 = vadd.f32 %v1581_v45, %v1580_v42  ;;  %v1622_v49 = vadd.f32 %v1621_v46, %v1620_v43 }
 0x23e   : > { %v1583_v50 = vpop.f32.mrf.mxu0  ;;  %v1623_v51 = vpop.f32.mrf.mxu1 }
 0x23f   : > { %1257 = vst [vmem:[%s2377_s1 + $0x20] sm:$0xff] %v1249_v47  ;;  %v1227_v52 = vadd.f32 %v1622_v49, %v1582_v48 }
 0x240   : > { %v1584_v53 = vpop.f32.mrf.mxu0  ;;  %v1624_v54 = vpop.f32.mrf.mxu1 }
 0x241   : > { %v1250_v55 = vadd.f32 %v2374_v5, %v1227_v52  ;;  %v1585_v56 = vadd.f32 %v1584_v53, %v1583_v50  ;;  %v1625_v57 = vadd.f32 %v1624_v54, %v1623_v51 }
 0x242   : > { %v1586_v58 = vpop.f32.mrf.mxu0  ;;  %v1626_v59 = vpop.f32.mrf.mxu1 }
 0x243   : > { %1258 = vst [vmem:[%s2377_s1 + $0x28] sm:$0xff] %v1250_v55  ;;  %v1232_v60 = vadd.f32 %v1625_v57, %v1585_v56 }
 0x244   : > { %v1587_v61 = vpop.f32.mrf.mxu0  ;;  %v1627_v62 = vpop.f32.mrf.mxu1 }
 0x245   : > { %v1251_v15 = vadd.f32 %v2374_v5, %v1232_v60  ;;  %v1588_v16 = vadd.f32 %v1587_v61, %v1586_v58  ;;  %v1628_v63 = vadd.f32 %v1627_v62, %v1626_v59 }
 0x247   : > { %1259 = vst [vmem:[%s2377_s1 + $0x30] sm:$0xff] %v1251_v15  ;;  %v1235_v0 = vadd.f32 %v1628_v63, %v1588_v16 }
 0x249   : > { %v1252_v13 = vadd.f32 %v2374_v5, %v1235_v0 }
 0x24b   : > { %1260 = vst [vmem:[%s2377_s1 + $0x38] sm:$0xff] %v1252_v13 }
 0x24c   : > { %1955 = shalt.err (!%p1952_p10)
}
 0x24d   : > { %s1956_s28 = scalar_lea.hbm %s2397_s15, 1024  ;;  %s1960_s12 = scalar_lea.hbm %s2483_s25, 8192 }
 0x24e   : > { %p1957_p12 = scmp.ne.s32.totalorder %s2397_s15, %s1956_s28  ;;  %p1961_p4 = scmp.lt.s32.totalorder %s2397_s15, %s2483_s25 }
 0x24f   : > { %p1962_p5 = scmp.lt.s32.totalorder %s1960_s12, %s1956_s28 }
 0x250   : > { %p1958_p2 = pnand %p1957_p12, %p2130_p9 }
 0x251   : > { %p1963_p8 = por %p1962_p5, %p1961_p4 }
 0x252   : > { %p1959_p3 = pneg %p1958_p2 }
 0x254   : > { %p1964_p13 = pnand %p1963_p8, %p1959_p3 }
 0x256   : > { %1967 = shalt.err (!%p1964_p13)
}
 0x257   : > { %s2043_s23 = smov 128   ;;  %s2044_s3 = smov 8  }
 0x258   : > { %1639 = dma.vmem_to_hbm [thread:$0]  (%p2130_p9), %s2399_s18, 1024, %s2397_s15, %s1262_s26, %s2043_s23, %s2043_s23, %s2044_s3  }
 0x259 PF: > { %s2484_s5 = sld [smem:[#allocation18_spill]] }
 0x25a   : > { %s2485_s7 = sld [smem:[#allocation16_spill]] }
 0x25f   : > { %p1662_p0 = scmp.ge.s32.totalorder %s2484_s5, 2 }
 0x260   : > { %s1292_s30 = sand.u32 1, %s2485_s7  }
 0x261   : > { %p1658_p1 = pnand %p1662_p0, %p2137_p11  ;;  %s1293_s1 = scalar_lea.sflag [#allocation4], %s1292_s30 }
 0x263   : > { %p1659_p6 = pneg %p1658_p1 }
 0x265   : > { %2005 = dma.done.wait (%p1659_p6), %s1293_s1, 1024  }
 0x266   : > { %2007 = vsyncadd (%p1659_p6), %s1293_s1, 4294966272  ;;  %s27_s23 = sadd.s32 1, %s2484_s5   ;;  %s2487_s20 = sld [smem:[#allocation17_spill]] }
 0x267   : > { %p24_p7 = scmp.ge.s32.totalorder %s27_s23, 10   ;;  %s2488_s6 = sld [smem:[#allocation20_spill]] }
 0x268   : > { %s2489_s9 = sld [smem:[#allocation19_spill]]  ;;  %s2490_s18 = smov %s2014_s19 }
 0x269   : > { %s2493_s21 = smov %s2026_s22 }
 0x26a   :  { %26 = sbr.rel (!%p24_p7) target bundleno = 14 (0xe), region = 133 }
 0x26c   : > { %s2491_s19 = smov %s2487_s20 }
 0x26d   : > { %s2492_s20 = smov %s2488_s6 }
 0x26e   : > { %s2494_s22 = smov %s2489_s9 }
 0x26f   :  { %1298 = vsyncpa [#allocation3], 1 }
 0x270   :  { %1300 = vsyncpa [#allocation3 + $0x1], 1 }
 0x271   :  { %1301 = vsyncpa [#allocation6], 1 }
 0x272   :  { %1303 = vsyncpa [#allocation6 + $0x1], 1 }
 0x273   :  { %1304 = vsyncpa [#allocation9], 1 }
 0x274   :  { %1306 = vsyncpa [#allocation9 + $0x1], 1 }
 0x275   :  { %1307 = vsyncpa [#allocation4], 1 }
 0x276   :  { %1309 = vsyncpa [#allocation4 + $0x1], 1 }

</bundles_post_ra>
